<compile_context>
chip_gen: v7x
topology: tpu7x:2x2x1
jax: 0.10.0
libtpu: 0.0.40
codegen_flags: <defaults>
</compile_context>

<pallas_src>
import functools

import jax
import jax.numpy as jnp
from jax.experimental import pallas as pl
from jax.experimental.pallas import tpu as pltpu


def _focal_loss_kernel(*refs, gamma, use_alpha, n_total):
    if use_alpha:
        logits_ref, targets_ref, alpha_ref, out_ref, acc_ref = refs
    else:
        logits_ref, targets_ref, out_ref, acc_ref = refs
        alpha_ref = None

    pid = pl.program_id(0)

    @pl.when(pid == 0)
    def _init():
        acc_ref[0] = jnp.float32(0.0)

    x = logits_ref[...].astype(jnp.float32)          # (TILE_N, C)
    t = targets_ref[...]                             # (TILE_N, 1) int32
    tn, c = x.shape

    # Boolean target mask (no f32 one-hot); reused for logit + alpha gathers.
    col = jax.lax.broadcasted_iota(jnp.int32, (tn, c), 1)
    is_tgt = col == t                                 # (TILE_N, C) bool

    # Numerically stable log-softmax cross entropy (reduction='none').
    m = jnp.max(x, axis=-1, keepdims=True)            # (TILE_N, 1)
    z = x - m
    lse = jnp.log(jnp.sum(jnp.exp(z), axis=-1, keepdims=True))
    tgt_logit = jnp.sum(jnp.where(is_tgt, z, 0.0), axis=-1, keepdims=True)
    ce = lse - tgt_logit                              # (TILE_N, 1)

    # Focal weighting: pt = exp(-ce); loss = (1 - pt)^gamma * ce
    pt = jnp.exp(-ce)
    omp = 1.0 - pt
    g_int = int(gamma)
    if float(g_int) == float(gamma) and 0 <= g_int <= 16:
        if g_int == 0:
            w = jnp.ones_like(omp)
        else:
            w = omp
            for _ in range(g_int - 1):                # gamma=2 -> omp*omp
                w = w * omp
    else:
        w = omp ** jnp.float32(gamma)                 # non-integer gamma fallback
    loss = w * ce

    if use_alpha:
        a = alpha_ref[...].astype(jnp.float32)        # (1, C), resident tile
        alpha_t = jnp.sum(jnp.where(is_tgt, a, 0.0), axis=-1, keepdims=True)
        loss = alpha_t * loss

    # Mask rows past the true batch size (last, possibly partial, tile).
    row = jax.lax.broadcasted_iota(jnp.int32, (tn, 1), 0) + pid * tn
    loss = jnp.where(row < n_total, loss, 0.0)

    acc_ref[0] += jnp.sum(loss)

    @pl.when(pid == pl.num_programs(0) - 1)
    def _finalize():
        out_ref[0, 0] = acc_ref[0] / jnp.float32(n_total)


def _choose_tile_n(n, c, itemsize, tile_n=None):
    if tile_n is None:
        # ~4 MiB per logits buffer; x2 double-buffering keeps total well under
        # v5e's 16 MiB default scoped VMEM and v7x's 64 MiB physical VMEM.
        per_buffer_budget = 4 * 1024 * 1024
        tile_n = max(8, per_buffer_budget // max(1, c * itemsize))
    tile_n = int(min(tile_n, n))
    if tile_n < n:
        tile_n = max(8, (tile_n // 8) * 8)            # sublane-aligned when not full-N
    return tile_n


def focal_loss(logits, targets, alpha=None, gamma=2.0, tile_n=None):
    """Pallas-TPU focal loss.

    logits:  (N, C) float (any float dtype; upcast to f32 inside the kernel)
    targets: (N,)   integer class indices in [0, C)
    alpha:   optional (C,) float per-class weights
    returns: scalar float32 mean focal loss
    """
    n, c = logits.shape
    targets_2d = targets.astype(jnp.int32).reshape(n, 1)
    use_alpha = alpha is not None

    tile_n = _choose_tile_n(n, c, jnp.dtype(logits.dtype).itemsize, tile_n)
    num_tiles = pl.cdiv(n, tile_n)

    in_specs = [
        pl.BlockSpec((tile_n, c), lambda i: (i, 0)),   # logits tile, native dtype
        pl.BlockSpec((tile_n, 1), lambda i: (i, 0)),   # targets tile
    ]
    args = [logits, targets_2d]
    if use_alpha:
        # Constant block index -> alpha stays resident, no re-DMA per tile.
        in_specs.append(pl.BlockSpec((1, c), lambda i: (0, 0)))
        args.append(alpha.astype(jnp.float32).reshape(1, c))

    kernel = functools.partial(
        _focal_loss_kernel, gamma=float(gamma), use_alpha=use_alpha, n_total=n
    )

    out = pl.pallas_call(
        kernel,
        out_shape=jax.ShapeDtypeStruct((1, 1), jnp.float32),
        grid_spec=pltpu.PrefetchScalarGridSpec(
            num_scalar_prefetch=0,
            grid=(num_tiles,),
            in_specs=in_specs,
            out_specs=pl.BlockSpec((1, 1), lambda i: (0, 0),
                                   memory_space=pltpu.SMEM),
            scratch_shapes=[pltpu.SMEM((1,), jnp.float32)],
        ),
        compiler_params=pltpu.CompilerParams(
            # N axis is a reduction with a resident accumulator.
            dimension_semantics=("arbitrary",),
            vmem_limit_bytes=32 * 1024 * 1024,
        ),
    )(*args)
    return out[0, 0]


def _focal_loss_ref(logits, targets, alpha=None, gamma=2.0):
    """Pure-JAX reference matching the PyTorch module semantics."""
    x = logits.astype(jnp.float32)
    logp = jax.nn.log_softmax(x, axis=-1)
    ce = -jnp.take_along_axis(logp, targets[:, None].astype(jnp.int32), axis=-1)[:, 0]
    pt = jnp.exp(-ce)
    loss = (1.0 - pt) ** gamma * ce
    if alpha is not None:
        loss = alpha.astype(jnp.float32)[targets] * loss
    return jnp.mean(loss)


if __name__ == "__main__":
    key = jax.random.PRNGKey(0)
    k1, k2, k3, k4 = jax.random.split(key, 4)

    # Case 1: f32 logits + per-class alpha (small shapes implied by the module).
    N, C = 8, 4
    logits = jax.random.normal(k1, (N, C), dtype=jnp.float32)
    targets = jax.random.randint(k2, (N,), 0, C, dtype=jnp.int32)
    alpha = jnp.linspace(0.5, 2.0, C, dtype=jnp.float32)
    out1 = jax.block_until_ready(focal_loss(logits, targets, alpha=alpha, gamma=2.0))
    ref1 = _focal_loss_ref(logits, targets, alpha=alpha, gamma=2.0)
    assert jnp.allclose(out1, ref1, atol=1e-5, rtol=1e-5), (out1, ref1)

    # Case 2: bf16 logits fed straight to the kernel (no wrapper upcast), no alpha,
    # forced small tile so the gridded accumulator + partial-tile masking path runs
    # (N=20 with TILE_N=8 -> 3 tiles, last one partial).
    N2, C2 = 20, 8
    logits2 = jax.random.normal(k3, (N2, C2), dtype=jnp.bfloat16)
    targets2 = jax.random.randint(k4, (N2,), 0, C2, dtype=jnp.int32)
    out2 = jax.block_until_ready(
        focal_loss(logits2, targets2, alpha=None, gamma=2.0, tile_n=8)
    )
    ref2 = _focal_loss_ref(logits2, targets2, alpha=None, gamma=2.0)
    assert jnp.allclose(out2, ref2, atol=1e-4, rtol=1e-4), (out2, ref2)

    print("KERNEL_OK")
</pallas_src>

<mosaic_0001>
module attributes {stable_mosaic.version = 11 : i64} {
  func.func @_focal_loss_kernel(%arg0: i32, %arg1: memref<8x4xf32, #tpu.memory_space<vmem>>, %arg2: memref<8x1xi32, #tpu.memory_space<vmem>>, %arg3: memref<1x4xf32, #tpu.memory_space<vmem>>, %arg4: memref<1x1xf32, #tpu.memory_space<smem>>, %arg5: memref<1xf32, #tpu.memory_space<smem>>) attributes {dimension_semantics = [#tpu.dimension_semantics<arbitrary>], iteration_bounds = array<i64: 1>, scalar_prefetch = 0 : i64, scratch_operands = 1 : i64, tpu.core_type = #tpu.core_type<tc>, window_params = [{transform_indices = @transform_0, window_bounds = array<i64: 8, 4>}, {transform_indices = @transform_1, window_bounds = array<i64: 8, 1>}, {pipeline_mode = #tpu.pipeline_mode<synchronous>, transform_indices = @transform_2, window_bounds = array<i64: 1, 4>}, {transform_indices = @transform_3, window_bounds = array<i64: 1, 1>}]} {
    %c0_i32 = arith.constant 0 : i32
    %0 = arith.cmpi eq, %arg0, %c0_i32 : i32
    %1 = arith.extui %0 : i1 to i32
    %c0_i32_0 = arith.constant 0 : i32
    %2 = arith.cmpi ne, %1, %c0_i32_0 : i32
    scf.if %2 {
      %cst_20 = arith.constant 0.000000e+00 : f32
      %c0_21 = arith.constant 0 : index
      %54 = memref.load %arg5[%c0_21] : memref<1xf32, #tpu.memory_space<smem>>
      memref.store %cst_20, %arg5[%c0_21] : memref<1xf32, #tpu.memory_space<smem>>
    } else {
    }
    %c0 = arith.constant 0 : index
    %c0_1 = arith.constant 0 : index
    %3 = vector.load %arg1[%c0, %c0_1] : memref<8x4xf32, #tpu.memory_space<vmem>>, vector<8x4xf32>
    %c0_2 = arith.constant 0 : index
    %c0_3 = arith.constant 0 : index
    %4 = vector.load %arg2[%c0_2, %c0_3] : memref<8x1xi32, #tpu.memory_space<vmem>>, vector<8x1xi32>
    %5 = tpu.iota {dimensions = array<i32: 1>} : vector<8x4xi32>
    %6 = vector.broadcast %4 : vector<8x1xi32> to vector<8x4xi32>
    %7 = arith.cmpi eq, %5, %6 : vector<8x4xi32>
    %cst = arith.constant dense<0xFF800000> : vector<8xf32>
    %8 = vector.multi_reduction <maximumf>, %3, %cst [1] : vector<8x4xf32> to vector<8xf32>
    %9 = vector.shape_cast %8 : vector<8xf32> to vector<8x1xf32>
    %10 = vector.broadcast %9 : vector<8x1xf32> to vector<8x4xf32>
    %11 = arith.subf %3, %10 : vector<8x4xf32>
    %12 = math.exp %11 : vector<8x4xf32>
    %cst_4 = arith.constant dense<0.000000e+00> : vector<8xf32>
    %13 = vector.multi_reduction <add>, %12, %cst_4 [1] : vector<8x4xf32> to vector<8xf32>
    %14 = vector.shape_cast %13 : vector<8xf32> to vector<8x1xf32>
    %15 = math.log %14 : vector<8x1xf32>
    %cst_5 = arith.constant 0.000000e+00 : f32
    %16 = vector.broadcast %cst_5 : f32 to vector<8x4xf32>
    %17 = arith.select %7, %11, %16 : vector<8x4xi1>, vector<8x4xf32>
    %cst_6 = arith.constant dense<0.000000e+00> : vector<8xf32>
    %18 = vector.multi_reduction <add>, %17, %cst_6 [1] : vector<8x4xf32> to vector<8xf32>
    %19 = vector.shape_cast %18 : vector<8xf32> to vector<8x1xf32>
    %20 = arith.subf %15, %19 : vector<8x1xf32>
    %cst_7 = arith.constant 0.000000e+00 : f32
    %21 = vector.broadcast %cst_7 : f32 to vector<8x1xf32>
    %22 = arith.subf %21, %20 : vector<8x1xf32>
    %23 = math.exp %22 : vector<8x1xf32>
    %cst_8 = arith.constant 1.000000e+00 : f32
    %24 = vector.broadcast %cst_8 : f32 to vector<8x1xf32>
    %25 = arith.subf %24, %23 : vector<8x1xf32>
    %26 = arith.mulf %25, %25 : vector<8x1xf32>
    %27 = arith.mulf %26, %20 : vector<8x1xf32>
    %c0_9 = arith.constant 0 : index
    %c0_10 = arith.constant 0 : index
    %28 = vector.load %arg3[%c0_9, %c0_10] : memref<1x4xf32, #tpu.memory_space<vmem>>, vector<1x4xf32>
    %cst_11 = arith.constant 0.000000e+00 : f32
    %29 = vector.shape_cast %28 : vector<1x4xf32> to vector<1x4xf32>
    %30 = vector.broadcast %29 : vector<1x4xf32> to vector<8x4xf32>
    %31 = vector.broadcast %cst_11 : f32 to vector<8x4xf32>
    %32 = arith.select %7, %30, %31 : vector<8x4xi1>, vector<8x4xf32>
    %cst_12 = arith.constant dense<0.000000e+00> : vector<8xf32>
    %33 = vector.multi_reduction <add>, %32, %cst_12 [1] : vector<8x4xf32> to vector<8xf32>
    %34 = vector.shape_cast %33 : vector<8xf32> to vector<8x1xf32>
    %35 = arith.mulf %34, %27 : vector<8x1xf32>
    %36 = tpu.iota {dimensions = array<i32: 0>} : vector<8x1xi32>
    %c8_i32 = arith.constant 8 : i32
    %37 = arith.muli %arg0, %c8_i32 : i32
    %38 = vector.broadcast %37 : i32 to vector<8x1xi32>
    %39 = arith.addi %36, %38 : vector<8x1xi32>
    %c8_i32_13 = arith.constant 8 : i32
    %40 = vector.broadcast %c8_i32_13 : i32 to vector<8x1xi32>
    %41 = arith.cmpi slt, %39, %40 : vector<8x1xi32>
    %cst_14 = arith.constant 0.000000e+00 : f32
    %42 = vector.broadcast %cst_14 : f32 to vector<8x1xf32>
    %43 = arith.select %41, %35, %42 : vector<8x1xi1>, vector<8x1xf32>
    %c0_15 = arith.constant 0 : index
    %44 = memref.load %arg5[%c0_15] : memref<1xf32, #tpu.memory_space<smem>>
    %45 = vector.shape_cast %43 : vector<8x1xf32> to vector<1x8x1xf32>
    %cst_16 = arith.constant dense<0.000000e+00> : vector<1xf32>
    %46 = vector.multi_reduction <add>, %45, %cst_16 [1, 2] : vector<1x8x1xf32> to vector<1xf32>
    %47 = vector.shape_cast %46 : vector<1xf32> to vector<1x1x1xf32>
    %48 = vector.extract %47[0, 0, 0] : f32 from vector<1x1x1xf32>
    %49 = arith.addf %44, %48 : f32
    %c0_17 = arith.constant 0 : index
    %50 = memref.load %arg5[%c0_17] : memref<1xf32, #tpu.memory_space<smem>>
    memref.store %49, %arg5[%c0_17] : memref<1xf32, #tpu.memory_space<smem>>
    %c0_i32_18 = arith.constant 0 : i32
    %51 = arith.cmpi eq, %arg0, %c0_i32_18 : i32
    %52 = arith.extui %51 : i1 to i32
    %c0_i32_19 = arith.constant 0 : i32
    %53 = arith.cmpi ne, %52, %c0_i32_19 : i32
    scf.if %53 {
      %c0_20 = arith.constant 0 : index
      %54 = memref.load %arg5[%c0_20] : memref<1xf32, #tpu.memory_space<smem>>
      %cst_21 = arith.constant 8.000000e+00 : f32
      %55 = arith.divf %54, %cst_21 : f32
      %c0_22 = arith.constant 0 : index
      %c0_23 = arith.constant 0 : index
      %56 = memref.load %arg4[%c0_22, %c0_23] : memref<1x1xf32, #tpu.memory_space<smem>>
      memref.store %55, %arg4[%c0_22, %c0_23] : memref<1x1xf32, #tpu.memory_space<smem>>
    } else {
    }
    return
  }
  func.func @transform_0(%arg0: i32) -> (i32, i32) {
    %c0_i32 = arith.constant 0 : i32
    %c0_i32_0 = arith.constant 0 : i32
    return %arg0, %c0_i32 : i32, i32
  }
  func.func @transform_1(%arg0: i32) -> (i32, i32) {
    %c0_i32 = arith.constant 0 : i32
    %c0_i32_0 = arith.constant 0 : i32
    return %arg0, %c0_i32 : i32, i32
  }
  func.func @transform_2(%arg0: i32) -> (i32, i32) {
    %c0_i32 = arith.constant 0 : i32
    %c0_i32_0 = arith.constant 0 : i32
    %c0_i32_1 = arith.constant 0 : i32
    return %c0_i32, %c0_i32_0 : i32, i32
  }
  func.func @transform_3(%arg0: i32) -> (i32, i32) {
    %c0_i32 = arith.constant 0 : i32
    %c0_i32_0 = arith.constant 0 : i32
    %c0_i32_1 = arith.constant 0 : i32
    return %c0_i32, %c0_i32_0 : i32, i32
  }
}

</mosaic_0001>

<bundles_post_ra>
// kernel: tpu_custom_call.1
= control target key start
LH: loop header
LB: loop body
LE: loop exit
PB: predicated region body
PF: predicated region fallthrough
CT: control target
= control target key end

     0   :  { %vm29_vm0 = vcmask 31744   ;;  %s179_s0 = inlined_call_operand.vmem [shape: f32[8,4], index: 0, kind: input, shape index: {}]   ;;  %s180_s1 = inlined_call_operand.vmem [shape: s32[8,1], index: 1, kind: input, shape index: {}]   ;;  %s181_s2 = inlined_call_operand.vmem [shape: f32[1,4], index: 2, kind: input, shape index: {}]   ;;  %s182_s3 = inlined_call_operand.hbm [shape: f32[1,1], index: 3, kind: output, shape index: {}]  }
   0x1   :  { %v21_v0 = vld [vmem:[%s179_s0] sm:$0xff] }
   0x2   :  { %8 = vsyncpa [#allocation4], 0  ;;  %v30_v1 = vsel %vm29_vm0, %v21_v0, -inf  ;;  %v132_v2 = vmov 0   ;;  %v22_v3 = vld [vmem:[%s180_s1] sm:$0xff]  ;;  %v23_v7 = vlaneseq  ;;  %vm72_vm2 = vcmask 7168  }
   0x3   :  { %113 = vset.pattern.permute.xlu0 %v132_v2  ;;  %v108_v12 = vld [vmem:[%s181_s2] ss:$0 sm:$0xff]  ;;  %s120_s19 = scalar_lea.hbm %s182_s3, 16 }
   0x4   :  { %31 = vmax.xlane.f32.xlu0 %v30_v1  ;;  %v24_v8 = vand.u32 127, %v23_v7  ;;  %p121_p0 = scmp.ne.s32.totalorder %s182_s3, %s120_s19  ;;  %p124_p1 = scmp.lt.u32.totalorder %s120_s19, %s182_s3 }
   0x6   :  { %p126_p2 = pnand %p124_p1, %p121_p0 }
  0x1a   :  { %26 = vperm.xlu0 %113, %v22_v3  }
  0x91   :  { %v32_v4 = vpop.xlane.xlu0 %31 }
  0x92   :  { %v33_v5 = vsub.f32 %v21_v0, %v32_v4 }
  0x94   :  { %v34_v6 = vmul.f32 1.442695, %v33_v5 }
  0x96   :  { %114 = vpow2.f32 %v34_v6 }
  0x99   :  { %v27_v9 = vpop.permute.xlu0 %26 }
  0x9a   :  { %vm28_vm1 = vcmp.eq.s32.totalorder %v24_v8, %v27_v9 }
  0x9b   :  { %v41_v13 = vsel %vm28_vm1, %v33_v5, 0.0  ;;  %v59_v14 = vsel %vm28_vm1, %v108_v12, 0.0 }
  0x9c   :  { %v42_v15 = vsel %vm29_vm0, %v41_v13, 0.0  ;;  %v60_v16 = vsel %vm29_vm0, %v59_v14, 0.0 }
  0xa0   :  { %v115_v10 = vpop.eup %114 }
  0xa1   :  { %v36_v11 = vsel %vm29_vm0, %v115_v10, 0.0 }
  0xa2   :  { %37 = vadd.xlane.f32.xlu1 %v36_v11 }
  0xa6   :  { %43 = vadd.xlane.f32.xlu1 %v42_v15 }
  0xaa   :  { %61 = vadd.xlane.f32.xlu1 %v60_v16 }
 0x12f   :  { %v38_v17 = vpop.xlane.xlu1 %37 }
 0x130   :  { %116 = vlog2.f32 %v38_v17 }
 0x133   :  { %v44_v20 = vpop.xlane.xlu1 %43 }
 0x137   :  { %v62_v28 = vpop.xlane.xlu1 %61 }
 0x13a   :  { %v117_v18 = vpop.eup %116 }
 0x13b   :  { %v40_v19 = vmul.f32 0.6931472, %v117_v18 }
 0x13d   :  { %v45_v21 = vsub.f32 %v40_v19, %v44_v20 }
 0x13f   :  { %v46_v22 = vsub.f32 0.0, %v45_v21 }
 0x141   :  { %v47_v23 = vmul.f32 1.442695, %v46_v22 }
 0x143   :  { %118 = vpow2.f32 %v47_v23 }
 0x14d   :  { %v119_v24 = vpop.eup %118 }
 0x14e   :  { %v49_v25 = vsub.f32 1.0, %v119_v24 }
 0x150   :  { %v50_v26 = vmul.f32 %v49_v25, %v49_v25 }
 0x152   :  { %v51_v27 = vmul.f32 %v50_v26, %v45_v21 }
 0x154   :  { %v63_v29 = vmul.f32 %v62_v28, %v51_v27 }
 0x156   :  { %v73_v30 = vsel %vm72_vm2, %v63_v29, 0.0 }
 0x157   :  { %74 = vadd.xlane.f32.xlu1 %v73_v30 }
 0x1e4   :  { %v75_v31 = vpop.xlane.xlu1 %74 }
 0x1e5   :  { %v76_v32 = vrot.slane %v75_v31, 4 }
 0x1e7   :  { %v77_v33 = vadd.f32 %v76_v32, %v75_v31 }
 0x1e9   :  { %v78_v34 = vrot.slane %v77_v33, 2 }
 0x1eb   :  { %v79_v35 = vadd.f32 %v78_v34, %v77_v33 }
 0x1ed   :  { %v80_v36 = vrot.slane %v79_v35, 1 }
 0x1ef   :  { %v81_v37 = vadd.f32 %v80_v36, %v79_v35 }
 0x1f1   :  { %109 = vpush %v81_v37 }
 0x222   :  { %s110_s1 = spop %109 }
 0x223   :  { %s92_s2 = smul.f32 0.125, %s110_s1 }
 0x225   :  { %94 = sst [smem:[#allocation3]] %s92_s2 }
 0x226   :  { %129 = shalt.err (!%p126_p2)
}
 0x227   :  { %s133_s24 = smov [#allocation3]  }
 0x228   :  { %102 = dma.smem_to_hbm %s133_s24, 16, %s182_s3, [#allocation4]  }
 0x229   :  { %130 = dma.done.wait [#allocation4], 16  }
 0x22a   :  { %131 = vsyncadd [#allocation4], 4294967280 }
 0x22b   :  { %106 = sfence }
 0x22c   :  { %107 = vsyncpa [#allocation4], 1 }

</bundles_post_ra>
